<compile_context>
chip_gen: v7x
topology: tpu7x:2x2x1
jax: 0.10.0
libtpu: 0.0.40
codegen_flags: <defaults>
</compile_context>

<pallas_src>
import jax
import jax.numpy as jnp
from jax.experimental import pallas as pl
from jax.experimental.pallas import tpu as pltpu


# ----------------------------------------------------------------------------
# Pallas kernel: fused 3-layer MLP (two ReLU hidden layers + linear head).
# The torch.cat is folded into layer 1 via row-split W1.
# ----------------------------------------------------------------------------
def _encoder_kernel(s_ref, a_ref, ns_ref,
                    w1s_ref, w1a_ref, w1ns_ref, b1_ref,
                    w2_ref, b2_ref, w3_ref, b3_ref,
                    out_ref):
    mxu_dt = w2_ref.dtype  # bf16 if caller stored bf16 weights (v6e/v7x), else f32

    # layer 1:  concat(s, a, ns) @ W1  ==  s@W1s + a@W1a + ns@W1ns
    z = jnp.dot(s_ref[...].astype(mxu_dt), w1s_ref[...],
                preferred_element_type=jnp.float32)
    z += jnp.dot(a_ref[...].astype(mxu_dt), w1a_ref[...],
                 preferred_element_type=jnp.float32)
    z += jnp.dot(ns_ref[...].astype(mxu_dt), w1ns_ref[...],
                 preferred_element_type=jnp.float32)
    z = jnp.maximum(z + b1_ref[...], 0.0)          # f32 bias + ReLU (v5e-safe)

    # layer 2
    z = jnp.dot(z.astype(mxu_dt), w2_ref[...],
                preferred_element_type=jnp.float32)
    z = jnp.maximum(z + b2_ref[...], 0.0)

    # layer 3 (logits head)
    logit = jnp.dot(z.astype(mxu_dt), w3_ref[...],
                    preferred_element_type=jnp.float32)
    out_ref[...] = (logit + b3_ref[...]).astype(out_ref.dtype)


# ----------------------------------------------------------------------------
# Wrapper
# ----------------------------------------------------------------------------
def encoder_forward(state, action, next_state, params, *,
                    tm=128, out_dtype=jnp.float32):
    """Fused Encoder forward.  `tm` is the batch tile (128 matches v5e's
    4x128^2 MXU; use 256 on v7x for full 256^2 MXU tiles)."""
    w1s, w1a, w1ns, b1, w2, b2, w3, b3 = params
    B, S = state.shape
    A = action.shape[1]
    H = w2.shape[0]
    Fdim = w3.shape[1]
    Din = 2 * S + A

    # Batch tiling: one grid point per TM rows.  For tiny B the block equals
    # the full array (no (8,128) padding requirement); otherwise pad B up to a
    # multiple of TM so every tile is full.
    if B <= tm:
        TM, Bp = B, B
    else:
        TM = tm
        Bp = pl.cdiv(B, TM) * TM
    if Bp != B:
        pad = ((0, Bp - B), (0, 0))
        state = jnp.pad(state, pad)
        action = jnp.pad(action, pad)
        next_state = jnp.pad(next_state, pad)

    grid = (Bp // TM,)

    def batch_tile(feat):                       # activations / output: tiled on batch
        return pl.BlockSpec((TM, feat), lambda i: (i, 0))

    def resident(arr):                          # weights/biases: VMEM-resident
        return pl.BlockSpec(arr.shape, lambda i: (0, 0))

    flops = 2 * B * (Din * H + H * H + H * Fdim)
    bytes_accessed = (int(state.nbytes) + int(action.nbytes) + int(next_state.nbytes)
                      + sum(int(p.nbytes) for p in params)
                      + Bp * Fdim * jnp.dtype(out_dtype).itemsize)
    cost = pl.CostEstimate(flops=flops, transcendentals=0,
                           bytes_accessed=bytes_accessed)

    out = pl.pallas_call(
        _encoder_kernel,
        out_shape=jax.ShapeDtypeStruct((Bp, Fdim), out_dtype),
        grid_spec=pltpu.PrefetchScalarGridSpec(
            num_scalar_prefetch=0,
            grid=grid,
            in_specs=[batch_tile(S), batch_tile(A), batch_tile(S),
                      resident(w1s), resident(w1a), resident(w1ns), resident(b1),
                      resident(w2), resident(b2),
                      resident(w3), resident(b3)],
            out_specs=batch_tile(Fdim)),
        compiler_params=pltpu.CompilerParams(
            dimension_semantics=("parallel",)),   # shards batch across v7x's 2 TCs
        cost_estimate=cost,
    )(state, action, next_state, w1s, w1a, w1ns, b1, w2, b2, w3, b3)

    return out[:B] if Bp != B else out


# ----------------------------------------------------------------------------
# Deterministic parameter construction (synthetic; PyTorch-Linear-style init).
# W1 is returned pre-split into (state / action / next_state) row blocks.
# ----------------------------------------------------------------------------
def make_params(key, state_dim, action_dim, hidden_dim, feature_dim,
                weight_dtype=jnp.float32):
    d_in = 2 * state_dim + action_dim
    ks = jax.random.split(key, 6)

    def linear(kw, kb, fan_in, fan_out):
        bound = 1.0 / jnp.sqrt(fan_in)
        w = jax.random.uniform(kw, (fan_in, fan_out), jnp.float32, -bound, bound)
        b = jax.random.uniform(kb, (1, fan_out), jnp.float32, -bound, bound)
        return w, b

    w1, b1 = linear(ks[0], ks[1], d_in, hidden_dim)
    w2, b2 = linear(ks[2], ks[3], hidden_dim, hidden_dim)
    w3, b3 = linear(ks[4], ks[5], hidden_dim, feature_dim)

    w1s = w1[:state_dim]
    w1a = w1[state_dim:state_dim + action_dim]
    w1ns = w1[state_dim + action_dim:]

    cast = lambda w: w.astype(weight_dtype)   # bf16 here halves weight DMA on v6e/v7x
    return (cast(w1s), cast(w1a), cast(w1ns), b1,
            cast(w2), b2, cast(w3), b3)


def _reference(state, action, next_state, params):
    w1s, w1a, w1ns, b1, w2, b2, w3, b3 = params
    w1 = jnp.concatenate([w1s, w1a, w1ns], axis=0).astype(jnp.float32)
    x = jnp.concatenate([state, action, next_state], axis=-1)
    z = jnp.maximum(x @ w1 + b1, 0.0)
    z = jnp.maximum(z @ w2.astype(jnp.float32) + b2, 0.0)
    return z @ w3.astype(jnp.float32) + b3


# ----------------------------------------------------------------------------
if __name__ == "__main__":
    batch = 2
    state_dim = 8
    action_dim = 4
    category_size = 16
    class_size = 16
    hidden_dim = 256
    feature_dim = category_size * class_size

    key = jax.random.PRNGKey(0)
    k_s, k_a, k_ns, k_p, k_big = jax.random.split(key, 5)

    state = jax.random.normal(k_s, (batch, state_dim), jnp.float32)
    action = jax.random.normal(k_a, (batch, action_dim), jnp.float32)
    next_state = jax.random.normal(k_ns, (batch, state_dim), jnp.float32)
    params = make_params(k_p, state_dim, action_dim, hidden_dim, feature_dim)

    # 1) Tiny-batch path (single grid point, full-array blocks).
    logits = encoder_forward(state, action, next_state, params)
    logits = jax.block_until_ready(logits)
    ref = _reference(state, action, next_state, params)
    assert logits.shape == (batch, feature_dim)
    assert jnp.allclose(logits, ref, atol=1e-5, rtol=1e-5)

    # 2) Batched path: exercises the grid, batch padding and resident weights.
    big_b = 300
    kb1, kb2, kb3 = jax.random.split(k_big, 3)
    bs = jax.random.normal(kb1, (big_b, state_dim), jnp.float32)
    ba = jax.random.normal(kb2, (big_b, action_dim), jnp.float32)
    bns = jax.random.normal(kb3, (big_b, state_dim), jnp.float32)
    big_logits = jax.block_until_ready(
        encoder_forward(bs, ba, bns, params, tm=128))
    big_ref = _reference(bs, ba, bns, params)
    assert big_logits.shape == (big_b, feature_dim)
    assert jnp.allclose(big_logits, big_ref, atol=1e-4, rtol=1e-4)

    # get_dist() reshape glue (distribution object itself is host-side logic):
    logits_ccs = logits.reshape(batch, category_size, class_size)
    assert logits_ccs.shape == (batch, category_size, class_size)
    # TODO(synk): td.Independent(OneHotCategoricalStraightThrough) sampling has
    # no Pallas equivalent; only the logits computation is kernelized.

    print("KERNEL_OK")
</pallas_src>

<mosaic_0001>
module attributes {stable_mosaic.version = 11 : i64} {
  func.func @_encoder_kernel(%arg0: i32, %arg1: memref<2x8xf32, #tpu.memory_space<vmem>>, %arg2: memref<2x4xf32, #tpu.memory_space<vmem>>, %arg3: memref<2x8xf32, #tpu.memory_space<vmem>>, %arg4: memref<8x256xf32, #tpu.memory_space<vmem>>, %arg5: memref<4x256xf32, #tpu.memory_space<vmem>>, %arg6: memref<8x256xf32, #tpu.memory_space<vmem>>, %arg7: memref<1x256xf32, #tpu.memory_space<vmem>>, %arg8: memref<256x256xf32, #tpu.memory_space<vmem>>, %arg9: memref<1x256xf32, #tpu.memory_space<vmem>>, %arg10: memref<256x256xf32, #tpu.memory_space<vmem>>, %arg11: memref<1x256xf32, #tpu.memory_space<vmem>>, %arg12: memref<2x256xf32, #tpu.memory_space<vmem>>) attributes {dimension_semantics = [#tpu.dimension_semantics<parallel>], iteration_bounds = array<i64: 1>, scalar_prefetch = 0 : i64, scratch_operands = 0 : i64, tpu.core_type = #tpu.core_type<tc>, window_params = [{transform_indices = @transform_0, window_bounds = array<i64: 2, 8>}, {transform_indices = @transform_1, window_bounds = array<i64: 2, 4>}, {transform_indices = @transform_2, window_bounds = array<i64: 2, 8>}, {pipeline_mode = #tpu.pipeline_mode<synchronous>, transform_indices = @transform_3, window_bounds = array<i64: 8, 256>}, {pipeline_mode = #tpu.pipeline_mode<synchronous>, transform_indices = @transform_4, window_bounds = array<i64: 4, 256>}, {pipeline_mode = #tpu.pipeline_mode<synchronous>, transform_indices = @transform_5, window_bounds = array<i64: 8, 256>}, {pipeline_mode = #tpu.pipeline_mode<synchronous>, transform_indices = @transform_6, window_bounds = array<i64: 1, 256>}, {pipeline_mode = #tpu.pipeline_mode<synchronous>, transform_indices = @transform_7, window_bounds = array<i64: 256, 256>}, {pipeline_mode = #tpu.pipeline_mode<synchronous>, transform_indices = @transform_8, window_bounds = array<i64: 1, 256>}, {pipeline_mode = #tpu.pipeline_mode<synchronous>, transform_indices = @transform_9, window_bounds = array<i64: 256, 256>}, {pipeline_mode = #tpu.pipeline_mode<synchronous>, transform_indices = @transform_10, window_bounds = array<i64: 1, 256>}, {transform_indices = @transform_11, window_bounds = array<i64: 2, 256>}]} {
    %c0 = arith.constant 0 : index
    %c0_0 = arith.constant 0 : index
    %0 = vector.load %arg1[%c0, %c0_0] : memref<2x8xf32, #tpu.memory_space<vmem>>, vector<2x8xf32>
    %c0_1 = arith.constant 0 : index
    %c0_2 = arith.constant 0 : index
    %1 = vector.load %arg4[%c0_1, %c0_2] : memref<8x256xf32, #tpu.memory_space<vmem>>, vector<8x256xf32>
    %cst = arith.constant dense<0.000000e+00> : vector<2x256xf32>
    %2 = tpu.matmul %0, %1, %cst {dimension_numbers = #tpu.dot_dimension_numbers<[1], [0], [0], [1], [0, 0, 1, 1], [], []>} : vector<2x8xf32>, vector<8x256xf32>, vector<2x256xf32> -> vector<2x256xf32>
    %c0_3 = arith.constant 0 : index
    %c0_4 = arith.constant 0 : index
    %3 = vector.load %arg2[%c0_3, %c0_4] : memref<2x4xf32, #tpu.memory_space<vmem>>, vector<2x4xf32>
    %c0_5 = arith.constant 0 : index
    %c0_6 = arith.constant 0 : index
    %4 = vector.load %arg5[%c0_5, %c0_6] : memref<4x256xf32, #tpu.memory_space<vmem>>, vector<4x256xf32>
    %cst_7 = arith.constant dense<0.000000e+00> : vector<2x256xf32>
    %5 = tpu.matmul %3, %4, %cst_7 {dimension_numbers = #tpu.dot_dimension_numbers<[1], [0], [0], [1], [0, 0, 1, 1], [], []>} : vector<2x4xf32>, vector<4x256xf32>, vector<2x256xf32> -> vector<2x256xf32>
    %6 = arith.addf %2, %5 : vector<2x256xf32>
    %c0_8 = arith.constant 0 : index
    %c0_9 = arith.constant 0 : index
    %7 = vector.load %arg3[%c0_8, %c0_9] : memref<2x8xf32, #tpu.memory_space<vmem>>, vector<2x8xf32>
    %c0_10 = arith.constant 0 : index
    %c0_11 = arith.constant 0 : index
    %8 = vector.load %arg6[%c0_10, %c0_11] : memref<8x256xf32, #tpu.memory_space<vmem>>, vector<8x256xf32>
    %cst_12 = arith.constant dense<0.000000e+00> : vector<2x256xf32>
    %9 = tpu.matmul %7, %8, %cst_12 {dimension_numbers = #tpu.dot_dimension_numbers<[1], [0], [0], [1], [0, 0, 1, 1], [], []>} : vector<2x8xf32>, vector<8x256xf32>, vector<2x256xf32> -> vector<2x256xf32>
    %10 = arith.addf %6, %9 : vector<2x256xf32>
    %c0_13 = arith.constant 0 : index
    %c0_14 = arith.constant 0 : index
    %11 = vector.load %arg7[%c0_13, %c0_14] : memref<1x256xf32, #tpu.memory_space<vmem>>, vector<1x256xf32>
    %12 = vector.broadcast %11 : vector<1x256xf32> to vector<2x256xf32>
    %13 = arith.addf %10, %12 : vector<2x256xf32>
    %cst_15 = arith.constant 0.000000e+00 : f32
    %14 = vector.broadcast %cst_15 : f32 to vector<2x256xf32>
    %15 = arith.maximumf %13, %14 : vector<2x256xf32>
    %c0_16 = arith.constant 0 : index
    %c0_17 = arith.constant 0 : index
    %16 = vector.load %arg8[%c0_16, %c0_17] : memref<256x256xf32, #tpu.memory_space<vmem>>, vector<256x256xf32>
    %cst_18 = arith.constant dense<0.000000e+00> : vector<2x256xf32>
    %17 = tpu.matmul %15, %16, %cst_18 {dimension_numbers = #tpu.dot_dimension_numbers<[1], [0], [0], [1], [0, 0, 1, 1], [], []>} : vector<2x256xf32>, vector<256x256xf32>, vector<2x256xf32> -> vector<2x256xf32>
    %c0_19 = arith.constant 0 : index
    %c0_20 = arith.constant 0 : index
    %18 = vector.load %arg9[%c0_19, %c0_20] : memref<1x256xf32, #tpu.memory_space<vmem>>, vector<1x256xf32>
    %19 = vector.broadcast %18 : vector<1x256xf32> to vector<2x256xf32>
    %20 = arith.addf %17, %19 : vector<2x256xf32>
    %cst_21 = arith.constant 0.000000e+00 : f32
    %21 = vector.broadcast %cst_21 : f32 to vector<2x256xf32>
    %22 = arith.maximumf %20, %21 : vector<2x256xf32>
    %c0_22 = arith.constant 0 : index
    %c0_23 = arith.constant 0 : index
    %23 = vector.load %arg10[%c0_22, %c0_23] : memref<256x256xf32, #tpu.memory_space<vmem>>, vector<256x256xf32>
    %cst_24 = arith.constant dense<0.000000e+00> : vector<2x256xf32>
    %24 = tpu.matmul %22, %23, %cst_24 {dimension_numbers = #tpu.dot_dimension_numbers<[1], [0], [0], [1], [0, 0, 1, 1], [], []>} : vector<2x256xf32>, vector<256x256xf32>, vector<2x256xf32> -> vector<2x256xf32>
    %c0_25 = arith.constant 0 : index
    %c0_26 = arith.constant 0 : index
    %25 = vector.load %arg11[%c0_25, %c0_26] : memref<1x256xf32, #tpu.memory_space<vmem>>, vector<1x256xf32>
    %26 = vector.broadcast %25 : vector<1x256xf32> to vector<2x256xf32>
    %27 = arith.addf %24, %26 : vector<2x256xf32>
    %c0_27 = arith.constant 0 : index
    %c0_28 = arith.constant 0 : index
    %28 = vector.load %arg12[%c0_27, %c0_28] : memref<2x256xf32, #tpu.memory_space<vmem>>, vector<2x256xf32>
    tpu.vector_store %arg12[%c0_27, %c0_28], %27 {strides = array<i32>} : memref<2x256xf32, #tpu.memory_space<vmem>>, vector<2x256xf32>,
    return
  }
  func.func @transform_0(%arg0: i32) -> (i32, i32) {
    %c0_i32 = arith.constant 0 : i32
    %c0_i32_0 = arith.constant 0 : i32
    return %arg0, %c0_i32 : i32, i32
  }
  func.func @transform_1(%arg0: i32) -> (i32, i32) {
    %c0_i32 = arith.constant 0 : i32
    %c0_i32_0 = arith.constant 0 : i32
    return %arg0, %c0_i32 : i32, i32
  }
  func.func @transform_2(%arg0: i32) -> (i32, i32) {
    %c0_i32 = arith.constant 0 : i32
    %c0_i32_0 = arith.constant 0 : i32
    return %arg0, %c0_i32 : i32, i32
  }
  func.func @transform_3(%arg0: i32) -> (i32, i32) {
    %c0_i32 = arith.constant 0 : i32
    %c0_i32_0 = arith.constant 0 : i32
    %c0_i32_1 = arith.constant 0 : i32
    return %c0_i32, %c0_i32_0 : i32, i32
  }
  func.func @transform_4(%arg0: i32) -> (i32, i32) {
    %c0_i32 = arith.constant 0 : i32
    %c0_i32_0 = arith.constant 0 : i32
    %c0_i32_1 = arith.constant 0 : i32
    return %c0_i32, %c0_i32_0 : i32, i32
  }
  func.func @transform_5(%arg0: i32) -> (i32, i32) {
    %c0_i32 = arith.constant 0 : i32
    %c0_i32_0 = arith.constant 0 : i32
    %c0_i32_1 = arith.constant 0 : i32
    return %c0_i32, %c0_i32_0 : i32, i32
  }
  func.func @transform_6(%arg0: i32) -> (i32, i32) {
    %c0_i32 = arith.constant 0 : i32
    %c0_i32_0 = arith.constant 0 : i32
    %c0_i32_1 = arith.constant 0 : i32
    return %c0_i32, %c0_i32_0 : i32, i32
  }
  func.func @transform_7(%arg0: i32) -> (i32, i32) {
    %c0_i32 = arith.constant 0 : i32
    %c0_i32_0 = arith.constant 0 : i32
    %c0_i32_1 = arith.constant 0 : i32
    return %c0_i32, %c0_i32_0 : i32, i32
  }
  func.func @transform_8(%arg0: i32) -> (i32, i32) {
    %c0_i32 = arith.constant 0 : i32
    %c0_i32_0 = arith.constant 0 : i32
    %c0_i32_1 = arith.constant 0 : i32
    return %c0_i32, %c0_i32_0 : i32, i32
  }
  func.func @transform_9(%arg0: i32) -> (i32, i32) {
    %c0_i32 = arith.constant 0 : i32
    %c0_i32_0 = arith.constant 0 : i32
    %c0_i32_1 = arith.constant 0 : i32
    return %c0_i32, %c0_i32_0 : i32, i32
  }
  func.func @transform_10(%arg0: i32) -> (i32, i32) {
    %c0_i32 = arith.constant 0 : i32
    %c0_i32_0 = arith.constant 0 : i32
    %c0_i32_1 = arith.constant 0 : i32
    return %c0_i32, %c0_i32_0 : i32, i32
  }
  func.func @transform_11(%arg0: i32) -> (i32, i32) {
    %c0_i32 = arith.constant 0 : i32
    %c0_i32_0 = arith.constant 0 : i32
    return %arg0, %c0_i32 : i32, i32
  }
}

</mosaic_0001>

<bundles_post_ra>
// kernel: tpu_custom_call.1
= control target key start
LH: loop header
LB: loop body
LE: loop exit
PB: predicated region body
PF: predicated region fallthrough
CT: control target
= control target key end

     0   :  { %16 = vsyncpa [#allocation3], 0  ;;  %s1186_s0 = inlined_call_operand.hbm [shape: f32[2,8], index: 0, kind: input, shape index: {}]   ;;  %s1187_s1 = inlined_call_operand.vmem [shape: f32[2,4], index: 1, kind: input, shape index: {}]   ;;  %s1188_s2 = inlined_call_operand.hbm [shape: f32[2,8], index: 2, kind: input, shape index: {}]   ;;  %s1189_s3 = inlined_call_operand.hbm [shape: f32[8,256], index: 3, kind: input, shape index: {}]   ;;  %s1190_s4 = inlined_call_operand.hbm [shape: f32[4,256], index: 4, kind: input, shape index: {}]   ;;  %s1191_s5 = inlined_call_operand.vmem [shape: f32[8,256], index: 5, kind: input, shape index: {}]   ;;  %s1192_s6 = inlined_call_operand.vmem [shape: f32[1,256], index: 6, kind: input, shape index: {}]   ;;  %s1193_s7 = inlined_call_operand.hbm [shape: f32[256,256], index: 7, kind: input, shape index: {}]   ;;  %s1194_s8 = inlined_call_operand.vmem [shape: f32[1,256], index: 8, kind: input, shape index: {}]   ;;  %s1195_s9 = inlined_call_operand.hbm [shape: f32[256,256], index: 9, kind: input, shape index: {}]   ;;  %s1196_s10 = inlined_call_operand.vmem [shape: f32[1,256], index: 10, kind: input, shape index: {}]   ;;  %s1197_s11 = inlined_call_operand.hbm [shape: f32[2,256], index: 11, kind: output, shape index: {}]  }
   0x1   :  { %17 = vsyncpa [#allocation6], 0 }
   0x2   :  { %18 = vsyncpa [#allocation9], 0 }
   0x3   :  { %19 = vsyncpa [#allocation12], 0 }
   0x4   :  { %20 = vsyncpa [#allocation4], 0  ;;  %s1009_s17 = smov [#allocation5]   ;;  %s1010_s19 = smov [#allocation8]  }
   0x5   :  { %s39_s18 = sshll.u32 %s1009_s17, 4  ;;  %s59_s20 = sshll.u32 %s1010_s19, 4  ;;  %s40_s18 = int_to_ptr.vmem [resolvable:$true] %s39_s18  ;;  %s60_s20 = int_to_ptr.vmem [resolvable:$true] %s59_s20 }
   0x6   :  { %s845_s23 = scalar_lea.hbm %s1188_s2, 32 }
   0x7   :  { %p846_p0 = scmp.ne.s32.totalorder %s1188_s2, %s845_s23  ;;  %p849_p1 = scmp.lt.u32.totalorder %s845_s23, %s1188_s2 }
   0x9   :  { %p851_p2 = pnand %p849_p1, %p846_p0 }
   0xb   :  { %854 = shalt.err (!%p851_p2)
}
   0xc   :  { %s855_s28 = scalar_lea.vmem %s40_s18, 32  ;;  %p860_p4 = scmp.lt.s32.totalorder %s40_s18, %s40_s18 }
   0xd   :  { %p856_p3 = scmp.ne.s32.totalorder %s40_s18, %s855_s28  ;;  %p861_p5 = scmp.lt.s32.totalorder %s855_s28, %s855_s28 }
   0xf   :  { %p862_p6 = por %p861_p5, %p860_p4 }
  0x11   :  { %p863_p7 = pnand %p862_p6, %p856_p3 }
  0x13   :  { %866 = shalt.err (!%p863_p7)
}
  0x14   :  { %42 = dma.hbm_to_vmem [thread:$0]  %s1188_s2, 32, %s40_s18, [#allocation6]  }
  0x15   :  { %s867_s14 = scalar_lea.hbm %s1190_s4, 128 }
  0x16   :  { %p868_p8 = scmp.ne.s32.totalorder %s1190_s4, %s867_s14  ;;  %p871_p9 = scmp.lt.u32.totalorder %s867_s14, %s1190_s4 }
  0x18   :  { %p873_p10 = pnand %p871_p9, %p868_p8 }
  0x1a   :  { %876 = shalt.err (!%p873_p10)
}
  0x1b   :  { %s877_s21 = scalar_lea.vmem %s60_s20, 128  ;;  %p882_p12 = scmp.lt.s32.totalorder %s60_s20, %s60_s20 }
  0x1c   :  { %p878_p11 = scmp.ne.s32.totalorder %s60_s20, %s877_s21  ;;  %p883_p13 = scmp.lt.s32.totalorder %s877_s21, %s877_s21 }
  0x1e   :  { %p884_p0 = por %p883_p13, %p882_p12 }
  0x20   :  { %p885_p1 = pnand %p884_p0, %p878_p11 }
  0x22   :  { %888 = shalt.err (!%p885_p1)
}
  0x23   :  { %62 = dma.hbm_to_vmem [thread:$0]  %s1190_s4, 128, %s60_s20, [#allocation9]  }
  0x24   :  { %s1011_s22 = smov [#allocation2]   ;;  %s1012_s24 = smov [#allocation7]  }
  0x25   :  { %s27_s23 = sshll.u32 %s1011_s22, 4  ;;  %s49_s25 = sshll.u32 %s1012_s24, 4  ;;  %s28_s23 = int_to_ptr.vmem [resolvable:$true] %s27_s23  ;;  %s50_s25 = int_to_ptr.vmem [resolvable:$true] %s49_s25 }
  0x26   :  { %s889_s28 = scalar_lea.hbm %s1186_s0, 32 }
  0x27   :  { %p890_p2 = scmp.ne.s32.totalorder %s1186_s0, %s889_s28  ;;  %p893_p3 = scmp.lt.u32.totalorder %s889_s28, %s1186_s0 }
  0x29   :  { %p895_p4 = pnand %p893_p3, %p890_p2 }
  0x2b   :  { %898 = shalt.err (!%p895_p4)
}
  0x2c   :  { %s899_s4 = scalar_lea.vmem %s28_s23, 32  ;;  %p904_p6 = scmp.lt.s32.totalorder %s28_s23, %s28_s23 }
  0x2d   :  { %p900_p5 = scmp.ne.s32.totalorder %s28_s23, %s899_s4  ;;  %p905_p7 = scmp.lt.s32.totalorder %s899_s4, %s899_s4 }
  0x2f   :  { %p906_p8 = por %p905_p7, %p904_p6 }
  0x31   :  { %p907_p9 = pnand %p906_p8, %p900_p5 }
  0x33   :  { %910 = shalt.err (!%p907_p9)
}
  0x34   :  { %30 = dma.hbm_to_vmem [thread:$0]  %s1186_s0, 32, %s28_s23, [#allocation3]  }
  0x35   :  { %s911_s17 = scalar_lea.hbm %s1189_s3, 256 }
  0x36   :  { %p912_p10 = scmp.ne.s32.totalorder %s1189_s3, %s911_s17  ;;  %p915_p11 = scmp.lt.u32.totalorder %s911_s17, %s1189_s3 }
  0x38   :  { %p917_p12 = pnand %p915_p11, %p912_p10 }
  0x3a   :  { %920 = shalt.err (!%p917_p12)
}
  0x3b   :  { %s921_s22 = scalar_lea.vmem %s50_s25, 256  ;;  %p926_p0 = scmp.lt.s32.totalorder %s50_s25, %s50_s25 }
  0x3c   :  { %p922_p13 = scmp.ne.s32.totalorder %s50_s25, %s921_s22  ;;  %p927_p1 = scmp.lt.s32.totalorder %s921_s22, %s921_s22 }
  0x3e   :  { %p928_p2 = por %p927_p1, %p926_p0 }
  0x40   :  { %p929_p3 = pnand %p928_p2, %p922_p13 }
  0x42   :  { %932 = shalt.err (!%p929_p3)
}
  0x43   :  { %52 = dma.hbm_to_vmem [thread:$0]  %s1189_s3, 256, %s50_s25, [#allocation6]  }
  0x44   :  { %s1013_s24 = smov [#allocation10]   ;;  %s933_s29 = scalar_lea.hbm %s1193_s7, 8192 }
  0x45   :  { %s72_s26 = sshll.u32 %s1013_s24, 4  ;;  %p934_p4 = scmp.ne.s32.totalorder %s1193_s7, %s933_s29  ;;  %s73_s26 = int_to_ptr.vmem [resolvable:$true] %s72_s26 }
  0x46   :  { %p937_p5 = scmp.lt.u32.totalorder %s933_s29, %s1193_s7 }
  0x48   :  { %p939_p6 = pnand %p937_p5, %p934_p4 }
  0x4a   :  { %942 = shalt.err (!%p939_p6)
}
  0x4b   :  { %s943_s20 = scalar_lea.vmem %s73_s26, 8192  ;;  %p948_p8 = scmp.lt.s32.totalorder %s73_s26, %s73_s26 }
  0x4c   :  { %p944_p7 = scmp.ne.s32.totalorder %s73_s26, %s943_s20  ;;  %p949_p9 = scmp.lt.s32.totalorder %s943_s20, %s943_s20 }
  0x4e   :  { %p950_p10 = por %p949_p9, %p948_p8 }
  0x50   :  { %p951_p11 = pnand %p950_p10, %p944_p7 }
  0x52   :  { %954 = shalt.err (!%p951_p11)
}
  0x53   :  { %s1014_s3 = smov 256   ;;  %s1015_s25 = smov 16  }
  0x54   :  { %78 = dma.hbm_to_vmem [thread:$0]  %s1193_s7, 8192, %s73_s26, [#allocation9], %s1014_s3, %s1014_s3, %s1015_s25  }
  0x55   :  { %s1016_s16 = smov [#allocation11]   ;;  %s955_s2 = scalar_lea.hbm %s1195_s9, 8192 }
  0x56   :  { %s86_s17 = sshll.u32 %s1016_s16, 4  ;;  %p956_p12 = scmp.ne.s32.totalorder %s1195_s9, %s955_s2  ;;  %s87_s17 = int_to_ptr.vmem [resolvable:$true] %s86_s17 }
  0x57   :  { %p959_p13 = scmp.lt.u32.totalorder %s955_s2, %s1195_s9 }
  0x59   :  { %p961_p0 = pnand %p959_p13, %p956_p12 }
  0x5b   :  { %964 = shalt.err (!%p961_p0)
}
  0x5c   :  { %s965_s24 = scalar_lea.vmem %s87_s17, 8192  ;;  %p970_p2 = scmp.lt.s32.totalorder %s87_s17, %s87_s17 }
  0x5d   :  { %p966_p1 = scmp.ne.s32.totalorder %s87_s17, %s965_s24  ;;  %p971_p3 = scmp.lt.s32.totalorder %s965_s24, %s965_s24 }
  0x5f   :  { %p972_p4 = por %p971_p3, %p970_p2 }
  0x61   :  { %p973_p5 = pnand %p972_p4, %p966_p1 }
  0x63   :  { %976 = shalt.err (!%p973_p5)
}
  0x64   :  { %92 = dma.hbm_to_vmem [thread:$0]  %s1195_s9, 8192, %s87_s17, [#allocation12], %s1014_s3, %s1014_s3, %s1015_s25  }
  0x65   :  { %999 = dma.done.wait [#allocation3], 32  }
  0x66   :  { %1000 = vsyncadd [#allocation3], 4294967264 }
  0x67   :  { %1001 = dma.done.wait [#allocation6], 288  }
  0x68   :  { %1002 = vsyncadd [#allocation6], 4294967008 }
  0x69   :  { %1003 = dma.done.wait [#allocation9], 8320  }
  0x6a   :  { %1004 = vsyncadd [#allocation9], 4294958976 }
  0x6b   :  { %1005 = dma.done.wait [#allocation12], 8192  }
  0x6c   :  { %1006 = vsyncadd [#allocation12], 4294959104  ;;  %v1017_v0 = vmov 0.0   ;;  %v115_v1 = vld [vmem:[#allocation7 + $0x8] sm:$0xff]  ;;  %v114_v2 = vld [vmem:[#allocation7] sm:$0xff]  ;;  %vm200_vm0 = vcmask 64512  }
  0x6d   :  { %268 = vmatprep.mubr.f32.mxu0 %v1017_v0  ;;  %193 = vmatprep.mubr.f32.mxu1 %v1017_v0  ;;  %v113_v3 = vld [vmem:[#allocation2] sm:$0x3]  ;;  %v277_v4 = vld [vmem:[%s1191_s5 + $0x8] sm:$0xff]  ;;  %v276_v5 = vld [vmem:[%s1191_s5] sm:$0xff]  ;;  %vm124_vm1 = vcmask 1043456   ;;  %vm120_vm2 = vcmask 31744  }
  0x6e   :  { %204 = vmatprep.subr.mxu0 %v115_v1  ;;  %v117_v6 = vld [vmem:[#allocation8] sm:$0xff]  ;;  %v116_v8 = vld [vmem:[%s1187_s1] sm:$0x3]  ;;  %v371_v9 = vld [vmem:[#allocation10 + $0x8] sm:$0xff] }
  0x6f   :  { %205 = vmatpush1.msra.mxu0 %v114_v2  ;;  %v119_v7 = vcombine.high %v117_v6, %v117_v6  ;;  %v373_v10 = vld [vmem:[#allocation10 + $0x18] sm:$0xff]  ;;  %v370_v11 = vld [vmem:[#allocation10] sm:$0xff]  ;;  %v372_v12 = vld [vmem:[#allocation10 + $0x10] sm:$0xff] }
  0x70   :  { %699 = vmatmul.mubr.msk.f32.vlgmr.msra.gmra.mrb[0].mxu0 %vm200_vm0, %v113_v3  ;;  %281 = vmatprep.subr.mxu0 %v277_v4  ;;  %v702_v13 = vpack.c.bf16 %v373_v10, %v371_v9  ;;  %v704_v14 = vpack.c.bf16 %v372_v12, %v370_v11  ;;  %v375_v15 = vld [vmem:[#allocation10 + $0x28] sm:$0xff]  ;;  %v377_v16 = vld [vmem:[#allocation10 + $0x38] sm:$0xff]  ;;  %v374_v17 = vld [vmem:[#allocation10 + $0x20] sm:$0xff] }
  0x71   :  { %282 = vmatpush1.msra.mxu0 %v276_v5  ;;  %696 = vmatprep.subr.msk.mxu1 %vm124_vm1, %v119_v7  ;;  %v706_v18 = vpack.c.bf16 %v377_v16, %v375_v15  ;;  %v376_v19 = vld [vmem:[#allocation10 + $0x30] sm:$0xff]  ;;  %v379_v20 = vld [vmem:[#allocation10 + $0x48] sm:$0xff]  ;;  %v381_v21 = vld [vmem:[#allocation10 + $0x58] sm:$0xff] }
  0x72   :  { %697 = vmatpush1.msk.msra.mxu1 %vm124_vm1, %v117_v6  ;;  %345 = vmatprep.mubr.f32.mxu0 %v1017_v0  ;;  %v708_v22 = vpack.c.bf16 %v376_v19, %v374_v17  ;;  %v275_v23 = vld [vmem:[#allocation5] sm:$0x3]  ;;  %v710_v24 = vpack.c.bf16 %v381_v21, %v379_v20  ;;  %v380_v26 = vld [vmem:[#allocation10 + $0x50] sm:$0xff]  ;;  %v383_v27 = vld [vmem:[#allocation10 + $0x68] sm:$0xff] }
  0x73   :  { %698 = vmatmul.mubr.msk.f32.vlgmr.msra.gmra.mrb[0].mxu1 %vm120_vm2, %v116_v8  ;;  %703 = vmatprep.subr.bf16.mxu1 %v702_v13  ;;  %v378_v25 = vld [vmem:[#allocation10 + $0x40] sm:$0xff]  ;;  %v385_v28 = vld [vmem:[#allocation10 + $0x78] sm:$0xff]  ;;  %v384_v32 = vld [vmem:[#allocation10 + $0x70] sm:$0xff] }
  0x74   :  { %705 = vmatpush1.bf16.msra.mxu1 %v704_v14  ;;  %v712_v29 = vpack.c.bf16 %v380_v26, %v378_v25  ;;  %v714_v30 = vpack.c.bf16 %v385_v28, %v383_v27  ;;  %v382_v31 = vld [vmem:[#allocation10 + $0x60] sm:$0xff]  ;;  %v387_v33 = vld [vmem:[#allocation10 + $0x88] sm:$0xff]  ;;  %v389_v34 = vld [vmem:[#allocation10 + $0x98] sm:$0xff] }
  0x75   :  { %707 = vmatprep.subr.bf16.mxu1 %v706_v18  ;;  %v716_v35 = vpack.c.bf16 %v384_v32, %v382_v31  ;;  %v718_v36 = vpack.c.bf16 %v389_v34, %v387_v33  ;;  %v386_v37 = vld [vmem:[#allocation10 + $0x80] sm:$0xff]  ;;  %v388_v38 = vld [vmem:[#allocation10 + $0x90] sm:$0xff]  ;;  %v391_v39 = vld [vmem:[#allocation10 + $0xa8] sm:$0xff] }
  0x76   :  { %v393_v40 = vld [vmem:[#allocation10 + $0xb8] sm:$0xff]  ;;  %v720_v41 = vpack.c.bf16 %v388_v38, %v386_v37  ;;  %v390_v43 = vld [vmem:[#allocation10 + $0xa0] sm:$0xff]  ;;  %v392_v44 = vld [vmem:[#allocation10 + $0xb0] sm:$0xff] }
  0x77   :  { %v722_v42 = vpack.c.bf16 %v393_v40, %v391_v39  ;;  %v395_v45 = vld [vmem:[#allocation10 + $0xc8] sm:$0xff]  ;;  %v397_v46 = vld [vmem:[#allocation10 + $0xd8] sm:$0xff]  ;;  %v724_v47 = vpack.c.bf16 %v392_v44, %v390_v43  ;;  %v394_v49 = vld [vmem:[#allocation10 + $0xc0] sm:$0xff] }
  0x78   :  { %700 = vmatmul.mubr.msk.f32.vlgmr.msra.gmra.mrb[0].mxu0 %vm200_vm0, %v275_v23  ;;  %709 = vmatpush1.bf16.msra.mxu1 %v708_v22  ;;  %v726_v48 = vpack.c.bf16 %v397_v46, %v395_v45  ;;  %v396_v50 = vld [vmem:[#allocation10 + $0xd0] sm:$0xff]  ;;  %v399_v51 = vld [vmem:[#allocation10 + $0xe8] sm:$0xff]  ;;  %v401_v52 = vld [vmem:[#allocation10 + $0xf8] sm:$0xff] }
  0x79   :  { %711 = vmatprep.subr.bf16.mxu1 %v710_v24  ;;  %v728_v53 = vpack.c.bf16 %v396_v50, %v394_v49  ;;  %v730_v54 = vpack.c.bf16 %v401_v52, %v399_v51  ;;  %v398_v55 = vld [vmem:[#allocation10 + $0xe0] sm:$0xff]  ;;  %v400_v56 = vld [vmem:[#allocation10 + $0xf0] sm:$0xff]  ;;  %v403_v57 = vld [vmem:[#allocation10 + $0x108] sm:$0xff] }
  0x7a   :  { %v405_v58 = vld [vmem:[#allocation10 + $0x118] sm:$0xff]  ;;  %v732_v59 = vpack.c.bf16 %v400_v56, %v398_v55  ;;  %v402_v61 = vld [vmem:[#allocation10 + $0x100] sm:$0xff]  ;;  %v404_v62 = vld [vmem:[#allocation10 + $0x110] sm:$0xff] }
  0x7b   :  { %v734_v60 = vpack.c.bf16 %v405_v58, %v403_v57  ;;  %v407_v63 = vld [vmem:[#allocation10 + $0x128] sm:$0xff]  ;;  %v409_v0 = vld [vmem:[#allocation10 + $0x138] sm:$0xff]  ;;  %v736_v1 = vpack.c.bf16 %v404_v62, %v402_v61  ;;  %v406_v3 = vld [vmem:[#allocation10 + $0x120] sm:$0xff] }
  0x7c   :  { %713 = vmatpush1.bf16.msra.mxu1 %v712_v29  ;;  %v738_v2 = vpack.c.bf16 %v409_v0, %v407_v63  ;;  %v408_v4 = vld [vmem:[#allocation10 + $0x130] sm:$0xff]  ;;  %v411_v5 = vld [vmem:[#allocation10 + $0x148] sm:$0xff]  ;;  %v413_v6 = vld [vmem:[#allocation10 + $0x158] sm:$0xff] }
  0x7d   :  { %715 = vmatprep.subr.bf16.mxu1 %v714_v30  ;;  %v740_v7 = vpack.c.bf16 %v408_v4, %v406_v3  ;;  %v742_v8 = vpack.c.bf16 %v413_v6, %v411_v5  ;;  %v410_v9 = vld [vmem:[#allocation10 + $0x140] sm:$0xff]  ;;  %v412_v10 = vld [vmem:[#allocation10 + $0x150] sm:$0xff]  ;;  %v415_v11 = vld [vmem:[#allocation10 + $0x168] sm:$0xff] }
  0x7e   :  { %v417_v12 = vld [vmem:[#allocation10 + $0x178] sm:$0xff]  ;;  %v744_v13 = vpack.c.bf16 %v412_v10, %v410_v9  ;;  %v414_v15 = vld [vmem:[#allocation10 + $0x160] sm:$0xff]  ;;  %v416_v16 = vld [vmem:[#allocation10 + $0x170] sm:$0xff] }
  0x7f   :  { %v746_v14 = vpack.c.bf16 %v417_v12, %v415_v11  ;;  %v419_v17 = vld [vmem:[#allocation10 + $0x188] sm:$0xff]  ;;  %v421_v18 = vld [vmem:[#allocation10 + $0x198] sm:$0xff]  ;;  %v748_v19 = vpack.c.bf16 %v416_v16, %v414_v15  ;;  %v418_v21 = vld [vmem:[#allocation10 + $0x180] sm:$0xff] }
  0x80   :  { %717 = vmatpush1.bf16.msra.mxu1 %v716_v35  ;;  %v750_v20 = vpack.c.bf16 %v421_v18, %v419_v17  ;;  %v420_v22 = vld [vmem:[#allocation10 + $0x190] sm:$0xff]  ;;  %v423_v23 = vld [vmem:[#allocation10 + $0x1a8] sm:$0xff]  ;;  %v425_v24 = vld [vmem:[#allocation10 + $0x1b8] sm:$0xff] }
  0x81   :  { %719 = vmatprep.subr.bf16.mxu1 %v718_v36  ;;  %v752_v25 = vpack.c.bf16 %v420_v22, %v418_v21  ;;  %v754_v26 = vpack.c.bf16 %v425_v24, %v423_v23  ;;  %v422_v27 = vld [vmem:[#allocation10 + $0x1a0] sm:$0xff]  ;;  %v424_v28 = vld [vmem:[#allocation10 + $0x1b0] sm:$0xff]  ;;  %v427_v30 = vld [vmem:[#allocation10 + $0x1c8] sm:$0xff] }
  0x82   :  { %v756_v29 = vpack.c.bf16 %v424_v28, %v422_v27  ;;  %v429_v31 = vld [vmem:[#allocation10 + $0x1d8] sm:$0xff]  ;;  %v426_v33 = vld [vmem:[#allocation10 + $0x1c0] sm:$0xff]  ;;  %v428_v34 = vld [vmem:[#allocation10 + $0x1d0] sm:$0xff] }
  0x83   :  { %v758_v32 = vpack.c.bf16 %v429_v31, %v427_v30  ;;  %v760_v35 = vpack.c.bf16 %v428_v34, %v426_v33  ;;  %v431_v36 = vld [vmem:[#allocation10 + $0x1e8] sm:$0xff]  ;;  %v433_v37 = vld [vmem:[#allocation10 + $0x1f8] sm:$0xff]  ;;  %v430_v39 = vld [vmem:[#allocation10 + $0x1e0] sm:$0xff] }
  0x84   :  { %721 = vmatpush1.bf16.msra.mxu1 %v720_v41  ;;  %v762_v38 = vpack.c.bf16 %v433_v37, %v431_v36  ;;  %v432_v40 = vld [vmem:[#allocation10 + $0x1f0] sm:$0xff]  ;;  %v522_v43 = vld [vmem:[#allocation11 + $0x18] sm:$0xff]  ;;  %v519_v44 = vld [vmem:[#allocation11] sm:$0xff] }
  0x85   :  { %723 = vmatprep.subr.bf16.mxu1 %v722_v42  ;;  %v764_v41 = vpack.c.bf16 %v432_v40, %v430_v39  ;;  %v520_v42 = vld [vmem:[#allocation11 + $0x8] sm:$0xff]  ;;  %v521_v46 = vld [vmem:[#allocation11 + $0x10] sm:$0xff]  ;;  %v523_v51 = vld [vmem:[#allocation11 + $0x20] sm:$0xff] }
  0x86   :  { %v766_v45 = vpack.c.bf16 %v522_v43, %v520_v42  ;;  %v768_v49 = vpack.c.bf16 %v521_v46, %v519_v44  ;;  %v525_v52 = vld [vmem:[#allocation11 + $0x30] sm:$0xff]  ;;  %v527_v57 = vld [vmem:[#allocation11 + $0x40] sm:$0xff]  ;;  %v556_v31 = vld [vmem:[#allocation11 + $0x128] sm:$0xff] }
  0x87   :  { %v772_v55 = vpack.c.bf16 %v525_v52, %v523_v51  ;;  %v529_v58 = vld [vmem:[#allocation11 + $0x50] sm:$0xff]  ;;  %v531_v63 = vld [vmem:[#allocation11 + $0x60] sm:$0xff]  ;;  %v560_v37 = vld [vmem:[#allocation11 + $0x148] sm:$0xff] }
  0x88   :  { %725 = vmatpush1.bf16.msra.mxu1 %v724_v47  ;;  %v524_v47 = vld [vmem:[#allocation11 + $0x28] sm:$0xff]  ;;  %767 = vmatprep.subr.bf16.mxu0 %v766_v45  ;;  %v776_v61 = vpack.c.bf16 %v529_v58, %v527_v57  ;;  %v533_v0 = vld [vmem:[#allocation11 + $0x70] sm:$0xff]  ;;  %v535_v5 = vld [vmem:[#allocation11 + $0x80] sm:$0xff] }
  0x89   :  { %727 = vmatprep.subr.bf16.mxu1 %v726_v48  ;;  %v526_v48 = vld [vmem:[#allocation11 + $0x38] sm:$0xff]  ;;  %769 = vmatpush1.bf16.msra.mxu0 %v768_v49  ;;  %v780_v3 = vpack.c.bf16 %v533_v0, %v531_v63  ;;  %v537_v6 = vld [vmem:[#allocation11 + $0x90] sm:$0xff]  ;;  %v539_v11 = vld [vmem:[#allocation11 + $0xa0] sm:$0xff] }
  0x8a   :  { %v770_v50 = vpack.c.bf16 %v526_v48, %v524_v47  ;;  %v784_v9 = vpack.c.bf16 %v537_v6, %v535_v5  ;;  %v541_v12 = vld [vmem:[#allocation11 + $0xb0] sm:$0xff]  ;;  %v543_v17 = vld [vmem:[#allocation11 + $0xc0] sm:$0xff]  ;;  %v564_v43 = vld [vmem:[#allocation11 + $0x168] sm:$0xff] }
  0x8b   :  { %v788_v15 = vpack.c.bf16 %v541_v12, %v539_v11  ;;  %v545_v18 = vld [vmem:[#allocation11 + $0xd0] sm:$0xff]  ;;  %v547_v23 = vld [vmem:[#allocation11 + $0xe0] sm:$0xff]  ;;  %v566_v44 = vld [vmem:[#allocation11 + $0x178] sm:$0xff] }
  0x8c   :  { %729 = vmatpush1.bf16.msra.mxu1 %v728_v53  ;;  %v528_v53 = vld [vmem:[#allocation11 + $0x48] sm:$0xff]  ;;  %771 = vmatprep.subr.bf16.mxu0 %v770_v50  ;;  %v792_v21 = vpack.c.bf16 %v545_v18, %v543_v17  ;;  %v549_v24 = vld [vmem:[#allocation11 + $0xf0] sm:$0xff]  ;;  %v810_v46 = vpack.c.bf16 %v566_v44, %v564_v43  ;;  %v563_v47 = vld [vmem:[#allocation11 + $0x160] sm:$0xff] }
  0x8d   :  { %731 = vmatprep.subr.bf16.mxu1 %v730_v54  ;;  %v530_v54 = vld [vmem:[#allocation11 + $0x58] sm:$0xff]  ;;  %773 = vmatpush1.bf16.msra.mxu0 %v772_v55  ;;  %v796_v27 = vpack.c.bf16 %v549_v24, %v547_v23  ;;  %v553_v30 = vld [vmem:[#allocation11 + $0x110] sm:$0xff]  ;;  %v568_v49 = vld [vmem:[#allocation11 + $0x188] sm:$0xff] }
  0x8e   :  { %v774_v56 = vpack.c.bf16 %v530_v54, %v528_v53  ;;  %v557_v36 = vld [vmem:[#allocation11 + $0x130] sm:$0xff]  ;;  %v570_v50 = vld [vmem:[#allocation11 + $0x198] sm:$0xff]  ;;  %v567_v53 = vld [vmem:[#allocation11 + $0x180] sm:$0xff] }
  0x8f   :  { %v561_v42 = vld [vmem:[#allocation11 + $0x150] sm:$0xff]  ;;  %v814_v52 = vpack.c.bf16 %v570_v50, %v568_v49  ;;  %v572_v55 = vld [vmem:[#allocation11 + $0x1a8] sm:$0xff]  ;;  %v575_v18 = vld [vmem:[#allocation11 + $0x1c0] sm:$0xff] }
  0x90   :  { %733 = vmatpush1.bf16.msra.mxu1 %v732_v59  ;;  %v532_v59 = vld [vmem:[#allocation11 + $0x68] sm:$0xff]  ;;  %775 = vmatprep.subr.bf16.mxu0 %v774_v56  ;;  %v565_v48 = vld [vmem:[#allocation11 + $0x170] sm:$0xff]  ;;  %v574_v56 = vld [vmem:[#allocation11 + $0x1b8] sm:$0xff] }
  0x91   :  { %735 = vmatprep.subr.bf16.mxu1 %v734_v60  ;;  %v534_v60 = vld [vmem:[#allocation11 + $0x78] sm:$0xff]  ;;  %777 = vmatpush1.bf16.msra.mxu0 %v776_v61  ;;  %v812_v51 = vpack.c.bf16 %v565_v48, %v563_v47  ;;  %v569_v54 = vld [vmem:[#allocation11 + $0x190] sm:$0xff]  ;;  %v818_v58 = vpack.c.bf16 %v574_v56, %v572_v55  ;;  %v576_v61 = vld [vmem:[#allocation11 + $0x1c8] sm:$0xff] }
  0x92   :  { %v778_v62 = vpack.c.bf16 %v534_v60, %v532_v59  ;;  %v816_v57 = vpack.c.bf16 %v569_v54, %v567_v53  ;;  %v571_v59 = vld [vmem:[#allocation11 + $0x1a0] sm:$0xff]  ;;  %v573_v60 = vld [vmem:[#allocation11 + $0x1b0] sm:$0xff] }
  0x93   :  { %v820_v63 = vpack.c.bf16 %v573_v60, %v571_v59  ;;  %v354_v5 = vld [vmem:[%s1192_s6] sm:$0x3]  ;;  %v579_v24 = vld [vmem:[#allocation11 + $0x1e0] sm:$0xff] }
  0x94   :  { %737 = vmatpush1.bf16.msra.mxu1 %v736_v1  ;;  %v536_v1 = vld [vmem:[#allocation11 + $0x88] sm:$0xff]  ;;  %779 = vmatprep.subr.bf16.mxu0 %v778_v62  ;;  %v578_v62 = vld [vmem:[#allocation11 + $0x1d8] sm:$0xff] }
  0x95   :  { %739 = vmatprep.subr.bf16.mxu1 %v738_v2  ;;  %v538_v2 = vld [vmem:[#allocation11 + $0x98] sm:$0xff]  ;;  %781 = vmatpush1.bf16.msra.mxu0 %v780_v3  ;;  %v822_v0 = vpack.c.bf16 %v578_v62, %v576_v61 }
  0x96   :  { %v782_v4 = vpack.c.bf16 %v538_v2, %v536_v1  ;;  %v356_v1 = vlaneseq }
  0x98   :  { %741 = vmatpush1.bf16.msra.mxu1 %v740_v7  ;;  %v540_v7 = vld [vmem:[#allocation11 + $0xa8] sm:$0xff]  ;;  %783 = vmatprep.subr.bf16.mxu0 %v782_v4  ;;  %v357_v2 = vshrl.u32 %v356_v1, 7 }
  0x99   :  { %743 = vmatprep.subr.bf16.mxu1 %v742_v8  ;;  %v542_v8 = vld [vmem:[#allocation11 + $0xb8] sm:$0xff]  ;;  %785 = vmatpush1.bf16.msra.mxu0 %v784_v9 }
  0x9a   :  { %v786_v10 = vpack.c.bf16 %v542_v8, %v540_v7  ;;  %v358_v4 = vsub.s32 0, %v357_v2  ;;  %v362_v7 = vsub.s32 1, %v357_v2 }
  0x9c   :  { %745 = vmatpush1.bf16.msra.mxu1 %v744_v13  ;;  %v544_v13 = vld [vmem:[#allocation11 + $0xc8] sm:$0xff]  ;;  %787 = vmatprep.subr.bf16.mxu0 %v786_v10  ;;  %v359_v8 = vrot.slane %v354_v5, %v358_v4  ;;  %v363_v10 = vrot.slane %v354_v5, %v362_v7 }
  0x9d   :  { %747 = vmatprep.subr.bf16.mxu1 %v746_v14  ;;  %v546_v14 = vld [vmem:[#allocation11 + $0xd8] sm:$0xff]  ;;  %789 = vmatpush1.bf16.msra.mxu0 %v788_v15 }
  0x9e   :  { %v790_v16 = vpack.c.bf16 %v546_v14, %v544_v13 }
  0xa0   :  { %749 = vmatpush1.bf16.msra.mxu1 %v748_v19  ;;  %v548_v19 = vld [vmem:[#allocation11 + $0xe8] sm:$0xff]  ;;  %791 = vmatprep.subr.bf16.mxu0 %v790_v16 }
  0xa1   :  { %751 = vmatprep.subr.bf16.mxu1 %v750_v20  ;;  %v550_v20 = vld [vmem:[#allocation11 + $0xf8] sm:$0xff]  ;;  %793 = vmatpush1.bf16.msra.mxu0 %v792_v21  ;;  %v580_v21 = vld [vmem:[#allocation11 + $0x1e8] sm:$0xff] }
  0xa2   :  { %v794_v22 = vpack.c.bf16 %v550_v20, %v548_v19  ;;  %v577_v19 = vld [vmem:[#allocation11 + $0x1d0] sm:$0xff] }
  0xa3   :  { %v824_v20 = vpack.c.bf16 %v577_v19, %v575_v18 }
  0xa4   :  { %753 = vmatpush1.bf16.msra.mxu1 %v752_v25  ;;  %v552_v25 = vld [vmem:[#allocation11 + $0x108] sm:$0xff]  ;;  %795 = vmatprep.subr.bf16.mxu0 %v794_v22  ;;  %v582_v22 = vld [vmem:[#allocation11 + $0x1f8] sm:$0xff] }
  0xa5   :  { %755 = vmatprep.subr.bf16.mxu1 %v754_v26  ;;  %v554_v26 = vld [vmem:[#allocation11 + $0x118] sm:$0xff]  ;;  %797 = vmatpush1.bf16.msra.mxu0 %v796_v27  ;;  %v826_v23 = vpack.c.bf16 %v582_v22, %v580_v21  ;;  %v434_v27 = vld [vmem:[%s1194_s8] sm:$0x3]  ;;  %s1018_s8 = smov [#allocation13]  }
  0xa6   :  { %v798_v28 = vpack.c.bf16 %v554_v26, %v552_v25  ;;  %v581_v25 = vld [vmem:[#allocation11 + $0x1f0] sm:$0xff]  ;;  %s684_s3 = sshll.u32 %s1018_s8, 4  ;;  %s685_s3 = int_to_ptr.vmem [resolvable:$true] %s684_s3 }
  0xa7   :  { %v828_v26 = vpack.c.bf16 %v581_v25, %v579_v24  ;;  %s977_s25 = scalar_lea.vmem %s685_s3, 64  ;;  %p982_p7 = scmp.lt.s32.totalorder %s685_s3, %s685_s3 }
  0xa8   :  { %757 = vmatpush1.bf16.msra.mxu1 %v756_v29  ;;  %v551_v29 = vld [vmem:[#allocation11 + $0x100] sm:$0xff]  ;;  %799 = vmatprep.subr.bf16.mxu0 %v798_v28  ;;  %v439_v28 = vrot.slane %v434_v27, %v358_v4  ;;  %p978_p6 = scmp.ne.s32.totalorder %s685_s3, %s977_s25  ;;  %p983_p8 = scmp.lt.s32.totalorder %s977_s25, %s977_s25 }
  0xa9   :  { %759 = vmatprep.subr.bf16.mxu1 %v758_v32  ;;  %v558_v32 = vld [vmem:[#allocation11 + $0x138] sm:$0xff]  ;;  %v800_v33 = vpack.c.bf16 %v553_v30, %v551_v29  ;;  %v443_v29 = vrot.slane %v434_v27, %v362_v7 }
  0xaa   :  { %v802_v34 = vpack.c.bf16 %v558_v32, %v556_v31  ;;  %p984_p9 = por %p983_p8, %p982_p7 }
  0xab   :  { %801 = vmatpush1.bf16.msra.mxu0 %v800_v33 }
  0xac   :  { %761 = vmatpush1.bf16.msra.mxu1 %v760_v35  ;;  %v555_v35 = vld [vmem:[#allocation11 + $0x120] sm:$0xff]  ;;  %803 = vmatprep.subr.bf16.mxu0 %v802_v34  ;;  %p985_p10 = pnand %p984_p9, %p978_p6 }
  0xad   :  { %763 = vmatprep.subr.bf16.mxu1 %v762_v38  ;;  %v562_v38 = vld [vmem:[#allocation11 + $0x158] sm:$0xff]  ;;  %v804_v39 = vpack.c.bf16 %v557_v36, %v555_v35  ;;  %v583_v36 = vld [vmem:[%s1196_s10] sm:$0x3] }
  0xae   :  { %v806_v40 = vpack.c.bf16 %v562_v38, %v560_v37  ;;  %v588_v37 = vrot.slane %v583_v36, %v358_v4  ;;  %v592_v38 = vrot.slane %v583_v36, %v362_v7 }
  0xaf   :  { %805 = vmatpush1.bf16.msra.mxu0 %v804_v39 }
  0xb0   :  { %765 = vmatpush1.bf16.msra.mxu1 %v764_v41  ;;  %v559_v41 = vld [vmem:[#allocation11 + $0x140] sm:$0xff]  ;;  %807 = vmatprep.subr.bf16.mxu0 %v806_v40 }
  0xb1   :  { %v808_v45 = vpack.c.bf16 %v561_v42, %v559_v41 }
  0xb3   :  { %809 = vmatpush1.bf16.msra.mxu0 %v808_v45 }
  0xb4   :  { %811 = vmatprep.subr.bf16.mxu0 %v810_v46 }
  0xb7   :  { %813 = vmatpush1.bf16.msra.mxu0 %v812_v51 }
  0xb8   :  { %815 = vmatprep.subr.bf16.mxu0 %v814_v52 }
  0xbb   :  { %817 = vmatpush1.bf16.msra.mxu0 %v816_v57 }
  0xbc   :  { %819 = vmatprep.subr.bf16.mxu0 %v818_v58 }
  0xbf   :  { %821 = vmatpush1.bf16.msra.mxu0 %v820_v63 }
  0xc0   :  { %823 = vmatprep.subr.bf16.mxu0 %v822_v0 }
  0xc3   :  { %825 = vmatpush1.bf16.msra.mxu0 %v824_v20 }
  0xc4   :  { %827 = vmatprep.subr.bf16.mxu0 %v826_v23 }
  0xc7   :  { %829 = vmatpush1.bf16.msra.mxu0 %v828_v26 }
 0x146   :  { %v195_v3 = vpop.f32.mrb[0].mxu1 }
 0x147   :  { %v197_v6 = vpop.f32.mrb[1].mxu1 }
 0x14b   :  { %v347_v9 = vpop.f32.mrb[0].mxu0 }
 0x14c   :  { %v830_v11 = vadd.f32 %v347_v9, %v195_v3  ;;  %v349_v12 = vpop.f32.mrb[1].mxu0 }
 0x14d   :  { %v831_v13 = vadd.f32 %v349_v12, %v197_v6 }
 0x14e   :  { %v366_v14 = vadd.f32 %v830_v11, %v359_v8 }
 0x14f   :  { %v367_v15 = vadd.f32 %v831_v13, %v363_v10 }
 0x150   :  { %v368_v17 = vmax.f32 %v366_v14, 0.0 }
 0x151   :  { %v369_v16 = vmax.f32 %v367_v15, 0.0 }
 0x153   :  { %510 = vmatprep.mubr.f32.mxu1 %v369_v16 }
 0x154   :  { %511 = vmatmul.mubr.f32.vlgmr.msra.gmra.mrb[2].mxu1 %v368_v17 }
 0x227   :  { %v512_v30 = vpop.f32.mrb[2].mxu1 }
 0x228   :  { %v513_v31 = vadd.f32 %v512_v30, %v439_v28  ;;  %v514_v32 = vpop.f32.mrb[3].mxu1 }
 0x229   :  { %v515_v33 = vadd.f32 %v514_v32, %v443_v29 }
 0x22a   :  { %v517_v35 = vmax.f32 %v513_v31, 0.0 }
 0x22b   :  { %v518_v34 = vmax.f32 %v515_v33, 0.0 }
 0x22d   :  { %659 = vmatprep.mubr.f32.mxu0 %v518_v34 }
 0x22e   :  { %660 = vmatmul.mubr.f32.vlgmr.msra.gmra.mrb[2].mxu0 %v517_v35 }
 0x301   :  { %v661_v39 = vpop.f32.mrb[2].mxu0 }
 0x302   :  { %v662_v40 = vadd.f32 %v661_v39, %v588_v37  ;;  %v663_v41 = vpop.f32.mrb[3].mxu0 }
 0x303   :  { %v664_v42 = vadd.f32 %v663_v41, %v592_v38 }
 0x305   :  { %v668_v43 = vcombine.low %v662_v40, %v664_v42 }
 0x307   :  { %701 = vst.sshfl [vmem:[#allocation13] sm:$0x33 pattern:$0x76325410] %v668_v43 }
 0x308   :  { %988 = shalt.err (!%p985_p10)
}
 0x309   :  { %s989_s15 = scalar_lea.hbm %s1197_s11, 64 }
 0x30a   :  { %p990_p11 = scmp.ne.s32.totalorder %s1197_s11, %s989_s15  ;;  %p993_p12 = scmp.lt.u32.totalorder %s989_s15, %s1197_s11 }
 0x30c   :  { %p995_p13 = pnand %p993_p12, %p990_p11 }
 0x30e   :  { %998 = shalt.err (!%p995_p13)
}
 0x30f   :  { %687 = dma.vmem_to_hbm [thread:$0]  %s685_s3, 64, %s1197_s11, [#allocation4]  }
 0x310   :  { %1007 = dma.done.wait [#allocation4], 64  }
 0x311   :  { %1008 = vsyncadd [#allocation4], 4294967232 }
 0x312   :  { %691 = vsyncpa [#allocation3], 1 }
 0x313   :  { %692 = vsyncpa [#allocation6], 1 }
 0x314   :  { %693 = vsyncpa [#allocation9], 1 }
 0x315   :  { %694 = vsyncpa [#allocation12], 1 }
 0x316   :  { %695 = vsyncpa [#allocation4], 1 }

</bundles_post_ra>
